<compile_context>
chip_gen: v6e
topology: v6e:2x2x1
jax: 0.10.0
libtpu: 0.0.40
codegen_flags: <defaults>
</compile_context>

<pallas_src>
import functools

import jax
import jax.numpy as jnp
import numpy as np
from jax import lax
from jax.experimental import pallas as pl
from jax.experimental.pallas import tpu as pltpu


# ----------------------------- Pallas kernel --------------------------------
def _flash_mhsa_kernel(x_ref, wq_ref, bq_ref, wkv_ref, bkv_ref, rel_ref,
                       out_ref,
                       lhs_sc, q_sc, m_sc, l_sc, acc_sc,
                       *, d, kv_t):
    # x_ref   : (1, N, C)    bf16  pixels for this batch, channels last
    # wq_ref  : (1, C, d)    bf16  this head's query weight columns (Wq^T slice)
    # bq_ref  : (1, 1, d)    f32
    # wkv_ref : (1, C, 2d)   bf16  this head's [Wk^T | Wv^T] columns
    # bkv_ref : (1, 1, 2d)   f32
    # rel_ref : (1, N, d)    bf16  this head's relative position embedding
    # out_ref : (1, 1, N, d) bf16  this (batch, head) output slab
    # scratch : lhs_sc (N,2d) bf16, q_sc (N,d) bf16, m/l (N,1) f32, acc (N,d) f32
    kv = pl.program_id(2)
    num_kv = pl.num_programs(2)

    # ---- once per (batch, head): q projection, lhs = [q | rel], state reset ----
    @pl.when(kv == 0)
    def _():
        x = x_ref[0]                                                   # (N, C) bf16
        q = jnp.dot(x, wq_ref[0], preferred_element_type=jnp.float32)  # (N, d) f32
        q = (q + bq_ref[0]).astype(jnp.bfloat16)
        q_sc[...] = q
        lhs_sc[...] = jnp.concatenate([q, rel_ref[0]], axis=-1)        # (N, 2d)
        m_sc[...] = jnp.full(m_sc.shape, -jnp.inf, dtype=jnp.float32)
        l_sc[...] = jnp.zeros(l_sc.shape, dtype=jnp.float32)
        acc_sc[...] = jnp.zeros(acc_sc.shape, dtype=jnp.float32)

    # ---- per kv tile: project [k|v] for the tile rows (disjoint columns, no
    #      redundant flops), fused energy matmul, online softmax update ----
    start = pl.multiple_of(kv * kv_t, kv_t)
    x_kv = x_ref[0, pl.ds(start, kv_t), :]                             # (kv_t, C) bf16
    kv_proj = jnp.dot(x_kv, wkv_ref[0], preferred_element_type=jnp.float32)
    kv_proj = kv_proj + bkv_ref[0]                                     # (kv_t, 2d) f32
    k_t = kv_proj[:, :d].astype(jnp.bfloat16)                          # (kv_t, d)
    v_t = kv_proj[:, d:].astype(jnp.bfloat16)                          # (kv_t, d)

    # energy[i, j] = q_i.k_j + rel_i.q_j   (single matmul, contraction 2d)
    q_kv = q_sc[pl.ds(start, kv_t), :]                                 # (kv_t, d)
    rhs = jnp.concatenate([k_t, q_kv], axis=-1)                        # (kv_t, 2d)
    energy = lax.dot_general(lhs_sc[...], rhs, (((1,), (1,)), ((), ())),
                             preferred_element_type=jnp.float32)       # (N, kv_t)

    # online softmax in f32; normalization deferred to the last kv step
    m_prev = m_sc[...]
    m_new = jnp.maximum(m_prev, jnp.max(energy, axis=-1, keepdims=True))
    alpha = jnp.exp(m_prev - m_new)                                    # (N, 1)
    p = jnp.exp(energy - m_new)                                        # (N, kv_t)
    l_sc[...] = alpha * l_sc[...] + jnp.sum(p, axis=-1, keepdims=True)
    acc_sc[...] = alpha * acc_sc[...] + jnp.dot(
        p.astype(jnp.bfloat16), v_t, preferred_element_type=jnp.float32)
    m_sc[...] = m_new

    # ---- last kv step: single deferred normalization + per-head store ----
    @pl.when(kv == num_kv - 1)
    def _():
        out_ref[0, 0] = (acc_sc[...] *
                         pl.reciprocal(l_sc[...], approx=True)).astype(out_ref.dtype)


def _pick_kv_tile(n):
    """Largest lane-friendly kv tile that divides N; monolithic for small N."""
    if n <= 512:
        return n
    for t in (512, 384, 256, 128):
        if n % t == 0:
            return t
    # TODO(synk): pad/mask ragged kv tails instead of falling back to monolithic.
    return n


# ------------------------------- wrapper -------------------------------------
def mhsa_pallas(x, Wq, bq, Wk, bk, Wv, bv, rel_h, rel_w, heads):
    """x: (B, C, W, H) float32 (NCHW, like the PyTorch module)."""
    B, C, W, H = x.shape
    d = C // heads
    N = W * H
    kv_t = _pick_kv_tile(N)
    num_kv = N // kv_t

    # --- glue: layout / parameter prep (plain JAX) ---
    # x: NCHW -> (B, N, C); bf16 for MXU rate + halved DMA bytes
    x_nc = jnp.transpose(x.reshape(B, C, N), (0, 2, 1)).astype(jnp.bfloat16)

    # per-head projection weight columns:  y_h = x @ W^T[:, h*d:(h+1)*d] + b_h
    def per_head(Wm):                      # (C_out, C_in) -> (heads, C_in, d)
        return jnp.transpose(Wm.T.reshape(C, heads, d), (1, 0, 2))

    wq_h = per_head(Wq).astype(jnp.bfloat16)                              # (heads, C, d)
    wkv_h = jnp.concatenate([per_head(Wk), per_head(Wv)],
                            axis=-1).astype(jnp.bfloat16)                 # (heads, C, 2d)
    bq_h = bq.reshape(heads, 1, d).astype(jnp.float32)
    bkv_h = jnp.concatenate([bk.reshape(heads, 1, d), bv.reshape(heads, 1, d)],
                            axis=-1).astype(jnp.float32)                  # (heads, 1, 2d)

    # relative position embedding, per head as (N, d)
    rel_t = jnp.transpose((rel_h + rel_w).reshape(heads, d, N),
                          (0, 2, 1)).astype(jnp.bfloat16)                 # (heads, N, d)

    kernel = functools.partial(_flash_mhsa_kernel, d=d, kv_t=kv_t)

    out = pl.pallas_call(
        kernel,
        out_shape=jax.ShapeDtypeStruct((B, heads, N, d), jnp.bfloat16),
        grid_spec=pltpu.PrefetchScalarGridSpec(
            num_scalar_prefetch=0,
            grid=(B, heads, num_kv),
            in_specs=[
                pl.BlockSpec((1, N, C), lambda b, h, kv: (b, 0, 0)),       # x (per batch)
                pl.BlockSpec((1, C, d), lambda b, h, kv: (h, 0, 0)),       # Wq head cols
                pl.BlockSpec((1, 1, d), lambda b, h, kv: (h, 0, 0)),       # bq head
                pl.BlockSpec((1, C, 2 * d), lambda b, h, kv: (h, 0, 0)),   # [Wk|Wv] head
                pl.BlockSpec((1, 1, 2 * d), lambda b, h, kv: (h, 0, 0)),   # [bk|bv] head
                pl.BlockSpec((1, N, d), lambda b, h, kv: (h, 0, 0)),       # rel head
            ],
            out_specs=pl.BlockSpec((1, 1, N, d), lambda b, h, kv: (b, h, 0, 0)),
            scratch_shapes=[
                pltpu.VMEM((N, 2 * d), jnp.bfloat16),   # lhs = [q | rel]
                pltpu.VMEM((N, d), jnp.bfloat16),       # q (rhs half, sliced per kv tile)
                pltpu.VMEM((N, 1), jnp.float32),        # running max
                pltpu.VMEM((N, 1), jnp.float32),        # running sum
                pltpu.VMEM((N, d), jnp.float32),        # output accumulator
            ],
        ),
        compiler_params=pltpu.CompilerParams(
            # batch + heads shard across TensorCores; kv is the accumulation axis
            dimension_semantics=("parallel", "parallel", "arbitrary"),
            vmem_limit_bytes=48 * 1024 * 1024,   # explicit; fits v5e/v6e/v7x budgets
        ),
    )(x_nc, wq_h, bq_h, wkv_h, bkv_h, rel_t)

    # --- glue: (B, heads, N, d) -> (B, heads, d, N) -> (B, C, W, H) ---
    out = jnp.transpose(out, (0, 1, 3, 2)).reshape(B, C, W, H)
    return out.astype(x.dtype)


# --------------------------- pure-JAX reference -------------------------------
def mhsa_ref(x, Wq, bq, Wk, bk, Wv, bv, rel_h, rel_w, heads):
    B, C, W, H = x.shape
    d = C // heads
    N = W * H

    def proj(Wm, bm):
        return jnp.einsum('oc,bcwh->bowh', Wm, x) + bm[None, :, None, None]

    q = proj(Wq, bq).reshape(B, heads, d, N)
    k = proj(Wk, bk).reshape(B, heads, d, N)
    v = proj(Wv, bv).reshape(B, heads, d, N)

    cc = jnp.einsum('bhdi,bhdj->bhij', q, k)
    rel = (rel_h + rel_w).reshape(heads, d, N)
    cp = jnp.einsum('hdi,bhdj->bhij', rel, q)
    energy = cc + cp
    attn = jax.nn.softmax(energy, axis=-1)
    out = jnp.einsum('bhdj,bhij->bhdi', v, attn)
    return out.reshape(B, C, W, H)


# --------------------------------- main ---------------------------------------
if __name__ == "__main__":
    # Small but representative shapes: n_dims=32, heads=4, width=height=8, batch=2
    B, C, W, H = 2, 32, 8, 8
    heads = 4
    d = C // heads

    key = jax.random.PRNGKey(0)
    keys = jax.random.split(key, 10)

    x = jax.random.normal(keys[0], (B, C, W, H), dtype=jnp.float32)

    # deterministic synthetic parameters (shapes from the module __init__)
    Wq = 0.1 * jax.random.normal(keys[1], (C, C), dtype=jnp.float32)  # Conv2d 1x1
    bq = 0.1 * jax.random.normal(keys[2], (C,), dtype=jnp.float32)
    Wk = 0.1 * jax.random.normal(keys[3], (C, C), dtype=jnp.float32)
    bk = 0.1 * jax.random.normal(keys[4], (C,), dtype=jnp.float32)
    Wv = 0.1 * jax.random.normal(keys[5], (C, C), dtype=jnp.float32)
    bv = 0.1 * jax.random.normal(keys[6], (C,), dtype=jnp.float32)
    rel_h = 0.1 * jax.random.normal(keys[7], (1, heads, d, 1, H), dtype=jnp.float32)
    rel_w = 0.1 * jax.random.normal(keys[8], (1, heads, d, W, 1), dtype=jnp.float32)

    out = jax.block_until_ready(
        mhsa_pallas(x, Wq, bq, Wk, bk, Wv, bv, rel_h, rel_w, heads))
    ref = jax.block_until_ready(
        mhsa_ref(x, Wq, bq, Wk, bk, Wv, bv, rel_h, rel_w, heads))

    # bf16 matmuls / bf16 output + approx reciprocal perturb results at ~1e-3
    np.testing.assert_allclose(np.asarray(out), np.asarray(ref),
                               rtol=2e-2, atol=2e-2)
    print("KERNEL_OK")
</pallas_src>

<mosaic_0001>
module attributes {stable_mosaic.version = 11 : i64} {
  func.func @_flash_mhsa_kernel(%arg0: i32, %arg1: i32, %arg2: i32, %arg3: memref<1x64x32xbf16, #tpu.memory_space<vmem>>, %arg4: memref<1x32x8xbf16, #tpu.memory_space<vmem>>, %arg5: memref<1x1x8xf32, #tpu.memory_space<vmem>>, %arg6: memref<1x32x16xbf16, #tpu.memory_space<vmem>>, %arg7: memref<1x1x16xf32, #tpu.memory_space<vmem>>, %arg8: memref<1x64x8xbf16, #tpu.memory_space<vmem>>, %arg9: memref<1x1x64x8xbf16, #tpu.memory_space<vmem>>, %arg10: memref<64x16xbf16, #tpu.memory_space<vmem>>, %arg11: memref<64x8xbf16, #tpu.memory_space<vmem>>, %arg12: memref<64x1xf32, #tpu.memory_space<vmem>>, %arg13: memref<64x1xf32, #tpu.memory_space<vmem>>, %arg14: memref<64x8xf32, #tpu.memory_space<vmem>>) attributes {dimension_semantics = [#tpu.dimension_semantics<parallel>, #tpu.dimension_semantics<parallel>, #tpu.dimension_semantics<arbitrary>], iteration_bounds = array<i64: 2, 4, 1>, scalar_prefetch = 0 : i64, scratch_operands = 5 : i64, tpu.core_type = #tpu.core_type<tc>, window_params = [{transform_indices = @transform_0, window_bounds = array<i64: 1, 64, 32>}, {transform_indices = @transform_1, window_bounds = array<i64: 1, 32, 8>}, {transform_indices = @transform_2, window_bounds = array<i64: 1, 1, 8>}, {transform_indices = @transform_3, window_bounds = array<i64: 1, 32, 16>}, {transform_indices = @transform_4, window_bounds = array<i64: 1, 1, 16>}, {transform_indices = @transform_5, window_bounds = array<i64: 1, 64, 8>}, {transform_indices = @transform_6, window_bounds = array<i64: 1, 1, 64, 8>}]} {
    %c0_i32 = arith.constant 0 : i32
    %0 = arith.cmpi eq, %arg2, %c0_i32 : i32
    %1 = arith.extui %0 : i1 to i32
    %c0_i32_0 = arith.constant 0 : i32
    %2 = arith.cmpi ne, %1, %c0_i32_0 : i32
    scf.if %2 {
      %c0_29 = arith.constant 0 : index
      %c0_30 = arith.constant 0 : index
      %c0_31 = arith.constant 0 : index
      %50 = vector.load %arg3[%c0_29, %c0_30, %c0_31] : memref<1x64x32xbf16, #tpu.memory_space<vmem>>, vector<1x64x32xbf16>
      %51 = vector.shape_cast %50 : vector<1x64x32xbf16> to vector<64x32xbf16>
      %c0_32 = arith.constant 0 : index
      %c0_33 = arith.constant 0 : index
      %c0_34 = arith.constant 0 : index
      %52 = vector.load %arg4[%c0_32, %c0_33, %c0_34] : memref<1x32x8xbf16, #tpu.memory_space<vmem>>, vector<1x32x8xbf16>
      %53 = vector.shape_cast %52 : vector<1x32x8xbf16> to vector<32x8xbf16>
      %cst_35 = arith.constant dense<0.000000e+00> : vector<64x8xf32>
      %54 = tpu.matmul %51, %53, %cst_35 {dimension_numbers = #tpu.dot_dimension_numbers<[1], [0], [0], [1], [0, 0, 1, 1], [], []>} : vector<64x32xbf16>, vector<32x8xbf16>, vector<64x8xf32> -> vector<64x8xf32>
      %c0_36 = arith.constant 0 : index
      %c0_37 = arith.constant 0 : index
      %c0_38 = arith.constant 0 : index
      %55 = vector.load %arg5[%c0_36, %c0_37, %c0_38] : memref<1x1x8xf32, #tpu.memory_space<vmem>>, vector<1x1x8xf32>
      %56 = vector.shape_cast %55 : vector<1x1x8xf32> to vector<1x8xf32>
      %57 = vector.broadcast %56 : vector<1x8xf32> to vector<64x8xf32>
      %58 = arith.addf %54, %57 : vector<64x8xf32>
      %59 = arith.truncf %58 : vector<64x8xf32> to vector<64x8xbf16>
      %c0_39 = arith.constant 0 : index
      %c0_40 = arith.constant 0 : index
      %60 = vector.load %arg11[%c0_39, %c0_40] : memref<64x8xbf16, #tpu.memory_space<vmem>>, vector<64x8xbf16>
      tpu.vector_store %arg11[%c0_39, %c0_40], %59 {strides = array<i32>} : memref<64x8xbf16, #tpu.memory_space<vmem>>, vector<64x8xbf16>,
      %c0_41 = arith.constant 0 : index
      %c0_42 = arith.constant 0 : index
      %c0_43 = arith.constant 0 : index
      %61 = vector.load %arg8[%c0_41, %c0_42, %c0_43] : memref<1x64x8xbf16, #tpu.memory_space<vmem>>, vector<1x64x8xbf16>
      %62 = vector.shape_cast %61 : vector<1x64x8xbf16> to vector<64x8xbf16>
      %63 = tpu.concatenate %59, %62 in 1 : vector<64x8xbf16>, vector<64x8xbf16> -> vector<64x16xbf16>
      %c0_44 = arith.constant 0 : index
      %c0_45 = arith.constant 0 : index
      %64 = vector.load %arg10[%c0_44, %c0_45] : memref<64x16xbf16, #tpu.memory_space<vmem>>, vector<64x16xbf16>
      tpu.vector_store %arg10[%c0_44, %c0_45], %63 {strides = array<i32>} : memref<64x16xbf16, #tpu.memory_space<vmem>>, vector<64x16xbf16>,
      %cst_46 = arith.constant 0xFF800000 : f32
      %65 = vector.broadcast %cst_46 : f32 to vector<64x1xf32>
      %c0_47 = arith.constant 0 : index
      %c0_48 = arith.constant 0 : index
      %66 = vector.load %arg12[%c0_47, %c0_48] : memref<64x1xf32, #tpu.memory_space<vmem>>, vector<64x1xf32>
      tpu.vector_store %arg12[%c0_47, %c0_48], %65 {strides = array<i32>} : memref<64x1xf32, #tpu.memory_space<vmem>>, vector<64x1xf32>,
      %cst_49 = arith.constant 0.000000e+00 : f32
      %67 = vector.broadcast %cst_49 : f32 to vector<64x1xf32>
      %c0_50 = arith.constant 0 : index
      %c0_51 = arith.constant 0 : index
      %68 = vector.load %arg13[%c0_50, %c0_51] : memref<64x1xf32, #tpu.memory_space<vmem>>, vector<64x1xf32>
      tpu.vector_store %arg13[%c0_50, %c0_51], %67 {strides = array<i32>} : memref<64x1xf32, #tpu.memory_space<vmem>>, vector<64x1xf32>,
      %cst_52 = arith.constant 0.000000e+00 : f32
      %69 = vector.broadcast %cst_52 : f32 to vector<64x8xf32>
      %c0_53 = arith.constant 0 : index
      %c0_54 = arith.constant 0 : index
      %70 = vector.load %arg14[%c0_53, %c0_54] : memref<64x8xf32, #tpu.memory_space<vmem>>, vector<64x8xf32>
      tpu.vector_store %arg14[%c0_53, %c0_54], %69 {strides = array<i32>} : memref<64x8xf32, #tpu.memory_space<vmem>>, vector<64x8xf32>,
    } else {
    }
    %c64_i32 = arith.constant 64 : i32
    %3 = arith.muli %arg2, %c64_i32 : i32
    %4 = tpu.assume_multiple %3, 64 : i32
    %c0 = arith.constant 0 : index
    %5 = arith.index_cast %4 : i32 to index
    %c0_1 = arith.constant 0 : index
    %6 = vector.load %arg3[%c0, %5, %c0_1] : memref<1x64x32xbf16, #tpu.memory_space<vmem>>, vector<1x64x32xbf16>
    %7 = vector.shape_cast %6 : vector<1x64x32xbf16> to vector<64x32xbf16>
    %c0_2 = arith.constant 0 : index
    %c0_3 = arith.constant 0 : index
    %c0_4 = arith.constant 0 : index
    %8 = vector.load %arg6[%c0_2, %c0_3, %c0_4] : memref<1x32x16xbf16, #tpu.memory_space<vmem>>, vector<1x32x16xbf16>
    %9 = vector.shape_cast %8 : vector<1x32x16xbf16> to vector<32x16xbf16>
    %cst = arith.constant dense<0.000000e+00> : vector<64x16xf32>
    %10 = tpu.matmul %7, %9, %cst {dimension_numbers = #tpu.dot_dimension_numbers<[1], [0], [0], [1], [0, 0, 1, 1], [], []>} : vector<64x32xbf16>, vector<32x16xbf16>, vector<64x16xf32> -> vector<64x16xf32>
    %c0_5 = arith.constant 0 : index
    %c0_6 = arith.constant 0 : index
    %c0_7 = arith.constant 0 : index
    %11 = vector.load %arg7[%c0_5, %c0_6, %c0_7] : memref<1x1x16xf32, #tpu.memory_space<vmem>>, vector<1x1x16xf32>
    %12 = vector.shape_cast %11 : vector<1x1x16xf32> to vector<1x16xf32>
    %13 = vector.broadcast %12 : vector<1x16xf32> to vector<64x16xf32>
    %14 = arith.addf %10, %13 : vector<64x16xf32>
    %15 = vector.extract_strided_slice %14 {offsets = [0, 0], sizes = [64, 8], strides = [1, 1]} : vector<64x16xf32> to vector<64x8xf32>
    %16 = arith.truncf %15 : vector<64x8xf32> to vector<64x8xbf16>
    %17 = vector.extract_strided_slice %14 {offsets = [0, 8], sizes = [64, 8], strides = [1, 1]} : vector<64x16xf32> to vector<64x8xf32>
    %18 = arith.truncf %17 : vector<64x8xf32> to vector<64x8xbf16>
    %19 = arith.index_cast %4 : i32 to index
    %c0_8 = arith.constant 0 : index
    %20 = vector.load %arg11[%19, %c0_8] : memref<64x8xbf16, #tpu.memory_space<vmem>>, vector<64x8xbf16>
    %21 = tpu.concatenate %16, %20 in 1 : vector<64x8xbf16>, vector<64x8xbf16> -> vector<64x16xbf16>
    %c0_9 = arith.constant 0 : index
    %c0_10 = arith.constant 0 : index
    %22 = vector.load %arg10[%c0_9, %c0_10] : memref<64x16xbf16, #tpu.memory_space<vmem>>, vector<64x16xbf16>
    %cst_11 = arith.constant dense<0.000000e+00> : vector<64x64xf32>
    %23 = tpu.matmul %22, %21, %cst_11 {dimension_numbers = #tpu.dot_dimension_numbers<[1], [1], [0], [0], [0, 0, 1, 0], [], []>} : vector<64x16xbf16>, vector<64x16xbf16>, vector<64x64xf32> -> vector<64x64xf32>
    %c0_12 = arith.constant 0 : index
    %c0_13 = arith.constant 0 : index
    %24 = vector.load %arg12[%c0_12, %c0_13] : memref<64x1xf32, #tpu.memory_space<vmem>>, vector<64x1xf32>
    %cst_14 = arith.constant dense<0xFF800000> : vector<64xf32>
    %25 = vector.multi_reduction <maximumf>, %23, %cst_14 [1] : vector<64x64xf32> to vector<64xf32>
    %26 = vector.shape_cast %25 : vector<64xf32> to vector<64x1xf32>
    %27 = arith.maximumf %24, %26 : vector<64x1xf32>
    %28 = arith.subf %24, %27 : vector<64x1xf32>
    %29 = math.exp %28 : vector<64x1xf32>
    %30 = vector.broadcast %27 : vector<64x1xf32> to vector<64x64xf32>
    %31 = arith.subf %23, %30 : vector<64x64xf32>
    %32 = math.exp %31 : vector<64x64xf32>
    %c0_15 = arith.constant 0 : index
    %c0_16 = arith.constant 0 : index
    %33 = vector.load %arg13[%c0_15, %c0_16] : memref<64x1xf32, #tpu.memory_space<vmem>>, vector<64x1xf32>
    %34 = arith.mulf %29, %33 : vector<64x1xf32>
    %cst_17 = arith.constant dense<0.000000e+00> : vector<64xf32>
    %35 = vector.multi_reduction <add>, %32, %cst_17 [1] : vector<64x64xf32> to vector<64xf32>
    %36 = vector.shape_cast %35 : vector<64xf32> to vector<64x1xf32>
    %37 = arith.addf %34, %36 : vector<64x1xf32>
    %c0_18 = arith.constant 0 : index
    %c0_19 = arith.constant 0 : index
    %38 = vector.load %arg13[%c0_18, %c0_19] : memref<64x1xf32, #tpu.memory_space<vmem>>, vector<64x1xf32>
    tpu.vector_store %arg13[%c0_18, %c0_19], %37 {strides = array<i32>} : memref<64x1xf32, #tpu.memory_space<vmem>>, vector<64x1xf32>,
    %c0_20 = arith.constant 0 : index
    %c0_21 = arith.constant 0 : index
    %39 = vector.load %arg14[%c0_20, %c0_21] : memref<64x8xf32, #tpu.memory_space<vmem>>, vector<64x8xf32>
    %40 = vector.broadcast %29 : vector<64x1xf32> to vector<64x8xf32>
    %41 = arith.mulf %40, %39 : vector<64x8xf32>
    %42 = arith.truncf %32 : vector<64x64xf32> to vector<64x64xbf16>
    %cst_22 = arith.constant dense<0.000000e+00> : vector<64x8xf32>
    %43 = tpu.matmul %42, %18, %cst_22 {dimension_numbers = #tpu.dot_dimension_numbers<[1], [0], [0], [1], [0, 0, 1, 1], [], []>} : vector<64x64xbf16>, vector<64x8xbf16>, vector<64x8xf32> -> vector<64x8xf32>
    %44 = arith.addf %41, %43 : vector<64x8xf32>
    %c0_23 = arith.constant 0 : index
    %c0_24 = arith.constant 0 : index
    %45 = vector.load %arg14[%c0_23, %c0_24] : memref<64x8xf32, #tpu.memory_space<vmem>>, vector<64x8xf32>
    tpu.vector_store %arg14[%c0_23, %c0_24], %44 {strides = array<i32>} : memref<64x8xf32, #tpu.memory_space<vmem>>, vector<64x8xf32>,
    %c0_25 = arith.constant 0 : index
    %c0_26 = arith.constant 0 : index
    %46 = vector.load %arg12[%c0_25, %c0_26] : memref<64x1xf32, #tpu.memory_space<vmem>>, vector<64x1xf32>
    tpu.vector_store %arg12[%c0_25, %c0_26], %27 {strides = array<i32>} : memref<64x1xf32, #tpu.memory_space<vmem>>, vector<64x1xf32>,
    %c0_i32_27 = arith.constant 0 : i32
    %47 = arith.cmpi eq, %arg2, %c0_i32_27 : i32
    %48 = arith.extui %47 : i1 to i32
    %c0_i32_28 = arith.constant 0 : i32
    %49 = arith.cmpi ne, %48, %c0_i32_28 : i32
    scf.if %49 {
      %c0_29 = arith.constant 0 : index
      %c0_30 = arith.constant 0 : index
      %50 = vector.load %arg14[%c0_29, %c0_30] : memref<64x8xf32, #tpu.memory_space<vmem>>, vector<64x8xf32>
      %c0_31 = arith.constant 0 : index
      %c0_32 = arith.constant 0 : index
      %51 = vector.load %arg13[%c0_31, %c0_32] : memref<64x1xf32, #tpu.memory_space<vmem>>, vector<64x1xf32>
      %52 = tpu.reciprocal %51 {approx = true} : vector<64x1xf32> -> vector<64x1xf32>
      %53 = vector.broadcast %52 : vector<64x1xf32> to vector<64x8xf32>
      %54 = arith.mulf %50, %53 : vector<64x8xf32>
      %55 = arith.truncf %54 : vector<64x8xf32> to vector<64x8xbf16>
      %c0_33 = arith.constant 0 : index
      %c0_34 = arith.constant 0 : index
      %c0_35 = arith.constant 0 : index
      %c0_36 = arith.constant 0 : index
      %56 = vector.load %arg9[%c0_33, %c0_34, %c0_35, %c0_36] : memref<1x1x64x8xbf16, #tpu.memory_space<vmem>>, vector<1x1x64x8xbf16>
      %57 = vector.shape_cast %56 : vector<1x1x64x8xbf16> to vector<64x8xbf16>
      %58 = vector.shape_cast %55 : vector<64x8xbf16> to vector<1x1x64x8xbf16>
      tpu.vector_store %arg9[%c0_33, %c0_34, %c0_35, %c0_36], %58 {strides = array<i32>} : memref<1x1x64x8xbf16, #tpu.memory_space<vmem>>, vector<1x1x64x8xbf16>,
    } else {
    }
    return
  }
  func.func @transform_0(%arg0: i32, %arg1: i32, %arg2: i32) -> (i32, i32, i32) {
    %c0_i32 = arith.constant 0 : i32
    %c0_i32_0 = arith.constant 0 : i32
    %c0_i32_1 = arith.constant 0 : i32
    return %arg0, %c0_i32, %c0_i32_0 : i32, i32, i32
  }
  func.func @transform_1(%arg0: i32, %arg1: i32, %arg2: i32) -> (i32, i32, i32) {
    %c0_i32 = arith.constant 0 : i32
    %c0_i32_0 = arith.constant 0 : i32
    %c0_i32_1 = arith.constant 0 : i32
    return %arg1, %c0_i32, %c0_i32_0 : i32, i32, i32
  }
  func.func @transform_2(%arg0: i32, %arg1: i32, %arg2: i32) -> (i32, i32, i32) {
    %c0_i32 = arith.constant 0 : i32
    %c0_i32_0 = arith.constant 0 : i32
    %c0_i32_1 = arith.constant 0 : i32
    return %arg1, %c0_i32, %c0_i32_0 : i32, i32, i32
  }
  func.func @transform_3(%arg0: i32, %arg1: i32, %arg2: i32) -> (i32, i32, i32) {
    %c0_i32 = arith.constant 0 : i32
    %c0_i32_0 = arith.constant 0 : i32
    %c0_i32_1 = arith.constant 0 : i32
    return %arg1, %c0_i32, %c0_i32_0 : i32, i32, i32
  }
  func.func @transform_4(%arg0: i32, %arg1: i32, %arg2: i32) -> (i32, i32, i32) {
    %c0_i32 = arith.constant 0 : i32
    %c0_i32_0 = arith.constant 0 : i32
    %c0_i32_1 = arith.constant 0 : i32
    return %arg1, %c0_i32, %c0_i32_0 : i32, i32, i32
  }
  func.func @transform_5(%arg0: i32, %arg1: i32, %arg2: i32) -> (i32, i32, i32) {
    %c0_i32 = arith.constant 0 : i32
    %c0_i32_0 = arith.constant 0 : i32
    %c0_i32_1 = arith.constant 0 : i32
    return %arg1, %c0_i32, %c0_i32_0 : i32, i32, i32
  }
  func.func @transform_6(%arg0: i32, %arg1: i32, %arg2: i32) -> (i32, i32, i32, i32) {
    %c0_i32 = arith.constant 0 : i32
    %c0_i32_0 = arith.constant 0 : i32
    %c0_i32_1 = arith.constant 0 : i32
    return %arg0, %arg1, %c0_i32, %c0_i32_0 : i32, i32, i32, i32
  }
}

</mosaic_0001>

<bundles_post_ra>
// kernel: tpu_custom_call.1
= control target key start
LH: loop header
LB: loop body
LE: loop exit
PB: predicated region body
PF: predicated region fallthrough
CT: control target
= control target key end

     0   :  { %s1975_s21 = smov 0   ;;  %s1977_s22 = smov 0   ;;  %s2376_s0 = inlined_call_operand.vmem [shape: bf16[2,64,32], index: 0, kind: input, shape index: {}]   ;;  %s2377_s1 = inlined_call_operand.vmem [shape: bf16[4,32,8], index: 1, kind: input, shape index: {}]   ;;  %s2378_s2 = inlined_call_operand.vmem [shape: f32[4,1,8], index: 2, kind: input, shape index: {}]   ;;  %s2379_s3 = inlined_call_operand.vmem [shape: bf16[4,32,16], index: 3, kind: input, shape index: {}]   ;;  %s2380_s4 = inlined_call_operand.vmem [shape: f32[4,1,16], index: 4, kind: input, shape index: {}]   ;;  %s2381_s5 = inlined_call_operand.vmem [shape: bf16[4,64,8], index: 5, kind: input, shape index: {}]   ;;  %s2382_s6 = inlined_call_operand.vmem [shape: bf16[2,4,64,8], index: 6, kind: output, shape index: {}]  }
   0x1   :  { %s1979_s23 = smov 0   ;;  %s1981_s24 = smov 0  }
   0x2   :  { %s1983_s25 = smov 0  }
   0x3 LB: > { %s31_s26 = sadd.s32 1, %s1925_s23  ;;  %s35_s27 = sadd.s32 1, %s1929_s24  ;;  %s1933_s25 = sphi %s1983_s25, %s16_s25   ;;  %s1929_s24 = sphi %s1981_s24, %s2386_s24   ;;  %s1925_s23 = sphi %s1979_s23, %s2385_s23   ;;  %s1921_s22 = sphi %s1977_s22, %s2384_s22   ;;  %s1917_s21 = sphi %s1975_s21, %s2383_s21  }
   0x4   : > { %p33_p0 = scmp.ge.s32.totalorder %s31_s26, 4  ;;  %p1588_p1 = scmp.ge.s32.totalorder %s1933_s25, 1 }
   0x5   : > { %p279_p2 = scmp.lt.s32.totalorder %s1933_s25, 9 }
   0x6   : > { %s2388_s26 = smov (%p33_p0, %s31_s26), 0  ;;  %s2390_s27 = smov (!%p33_p0, %s35_s27), %s1929_s24 }
   0x7   : > { %p280_p3 = pnand %p1588_p1, %p279_p2  ;;  %p37_p4 = scmp.ge.s32.totalorder %s2390_s27, 2 }
   0x8   : > { %p339_p5 = scmp.lt.s32.totalorder (!%p280_p3), %s1917_s21, 3  ;;  %p334_p6 = scmp.lt.s32.totalorder (!%p280_p3), %s1921_s22, 1 }
   0x9   : > { %s2392_s27 = smov (%p37_p4, %s2390_s27), 0  ;;  %283 = sbr.rel (%p280_p3) target bundleno = 1189 (0x4a5), region = 44 }
   0xa   : > { %s1935_s29 = smov (!%p280_p3), 8   ;;  %s1939_s10 = smov (!%p280_p3), 120  }
   0xe   : > { %s2394_s21 = smov (!%p339_p5, %s1917_s21), 3  ;;  %s2396_s22 = smov (!%p334_p6, %s1921_s22), 1  ;;  %vm425_vm0 = vcmask 261120   ;;  %vm535_vm1 = vcmask 60416   ;;  %vm580_vm2 = vcmask 64512   ;;  %vm621_vm3 = vcmask 125952  }
   0xf   : > { %s1669_s28 = sshll.u32 %s2394_s21, 4  ;;  %s1668_s8 = sshll.u32 %s2396_s22, 5  ;;  %vm872_vm4 = vcmask 130048   ;;  %vm630_vm5 = vcmask 7168   ;;  %vm966_vm6 = vcmask 523264  }
  0x10   : > { %s343_s7 = scalar_lea.vmem %s2377_s1, %s1669_s28  ;;  %s338_s11 = scalar_lea.vmem %s2376_s0, %s1668_s8 }
  0x11   : > { %v1823_v0 = vld [vmem:[%s343_s7 + $0x8] sm:$0xff]   ;;  %v1824_v1 = vld [vmem:[%s343_s7] sm:$0xff]   ;;  %s351_s14 = scalar_lea.vmem %s2379_s3, %s1669_s28  ;;  %v1827_v4 = vld [vmem:[%s338_s11 + $0x10] sm:$0xff]   ;;  %s1671_s15 = sshll.u32 %s2394_s21, 5 }
  0x12   : > { %1716 = vmatprep.subr.bf16.mxu0 %v1823_v0  ;;  %v1825_v2 = vld [vmem:[%s338_s11] sm:$0xff]   ;;  %v1826_v3 = vld [vmem:[%s338_s11 + $0x8] sm:$0xff]   ;;  %v1833_v9 = vld [vmem:[%s338_s11 + $0x10] sm:$0xff]   ;;  %s2034_s18 = scalar_lea.vmem %s2381_s5, %s1671_s15  ;;  %s346_s28 = scalar_lea.vmem %s2378_s2, %s2394_s21 }
  0x13   : > { %1717 = vmatpush3.bf16.msra.mxu0 %v1823_v0  ;;  %1720 = vmatprep.mubr.msk.bf16.mxu0 %vm425_vm0, %v1825_v2  ;;  %v1829_v5 = vld [vmem:[%s351_s14 + $0x8] sm:$0xff]   ;;  %v1830_v6 = vld [vmem:[%s351_s14] sm:$0xff]   ;;  %v1828_v10 = vld [vmem:[%s338_s11 + $0x18] sm:$0xff]   ;;  %s354_s9 = scalar_lea.vmem %s2380_s4, %s2394_s21 }
  0x14   : > { %1718 = vmatprep.subr.bf16.mxu0 %v1824_v1  ;;  %1728 = vmatprep.subr.bf16.mxu1 %v1829_v5  ;;  %v1831_v7 = vld [vmem:[%s338_s11] sm:$0xff]   ;;  %v1832_v8 = vld [vmem:[%s338_s11 + $0x8] sm:$0xff]   ;;  %v1834_v11 = vld [vmem:[%s338_s11 + $0x18] sm:$0xff]   ;;  %s1597_s11 = sshll.u32 %s2394_s21, 3 }
  0x15   : > { %1729 = vmatpush3.bf16.msra.mxu1 %v1829_v5  ;;  %1732 = vmatprep.mubr.msk.bf16.mxu1 %vm425_vm0, %v1831_v7  ;;  %v1600_v12 = vld [vmem:[%s346_s28] ss:$0 sm:$0xff]  ;;  %v1840_v45 = vld [vmem:[%s2034_s18 + $0x18] sm:$0xff]   ;;  %v1841_v47 = vld [vmem:[%s2034_s18 + $0x8] sm:$0xff]   ;;  %s366_s12 = sadd.s32 %s1668_s8, %s1597_s11 }
  0x16   : > { %1730 = vmatprep.subr.bf16.mxu1 %v1830_v6  ;;  %v1836_v42 = vld [vmem:[%s2034_s18] sm:$0xff]   ;;  %v1842_v48 = vld [vmem:[%s2034_s18 + $0x10] sm:$0xff]   ;;  %s1599_s13 = sshll.u32 %s366_s12, 2 }
  0x17   : > { %1719 = vmatpush3.bf16.msra.mxu0 %v1824_v1  ;;  %v1631_v57 = vld [vmem:[%s354_s9] ss:$0 sm:$0xff]  ;;  %s2343_s16 = scalar_lea.vmem %s2382_s6, %s1599_s13 }
  0x19   : > { %1731 = vmatpush3.bf16.msra.mxu1 %v1830_v6 }
  0x1a   : > { %1721 = vmatmul.mubr.msk.bf16.vlgmr.msra.gmra.mxu0 %vm425_vm0, %v1826_v3 }
  0x1b   : > { %1724 = vmatprep.mubr.msk.bf16.mxu0 %vm425_vm0, %v1827_v4 }
  0x1c   : > { %1733 = vmatmul.mubr.msk.bf16.vlgmr.msra.gmra.mxu1 %vm425_vm0, %v1832_v8 }
  0x1d   : > { %1736 = vmatprep.mubr.msk.bf16.mxu1 %vm425_vm0, %v1833_v9 }
  0x22   : > { %1725 = vmatmul.mubr.msk.bf16.gmra.mxu0 %vm425_vm0, %v1828_v10 }
  0x24   : > { %1737 = vmatmul.mubr.msk.bf16.gmra.mxu1 %vm425_vm0, %v1834_v11 }
  0xda   : > { %v1722_v13 = vpop.f32.mrf.mxu0 }
  0xdb   : > { %v2040_v14 = vadd.f32 %v1722_v13, %v1600_v12 }
  0xdc   : > { %v472_v15 = vpop.f32.mrf.mxu0  ;;  %v1734_v49 = vpop.f32.mrf.mxu1 }
  0xdd   : > { %v1674_v16 = vpack.c.bf16 %v2040_v14, %v2040_v14  ;;  %v2044_v17 = vadd.f32 %v1600_v12, %v472_v15  ;;  %v767_v11 = vadd.f32 %v1734_v49, %v1631_v57 }
  0xde   : > { %v1723_v18 = vpop.f32.mrf.mxu0  ;;  %v758_v50 = vpop.f32.mrf.mxu1 }
  0xdf   : > { %538 = vst.msk [vmem:[#allocation3 + $0x8] sm:$0xf] %vm535_vm1, %v1674_v16  ;;  %v1672_v19 = vpack.c.bf16 %v2044_v17, %v2044_v17  ;;  %v2049_v20 = vadd.f32 %v1723_v18, %v1600_v12 }
  0xe0   : > { %v475_v21 = vpop.f32.mrf.mxu0  ;;  %v1735_v51 = vpop.f32.mrf.mxu1 }
  0xe1   : > { %536 = vst.msk [vmem:[#allocation3] sm:$0xf] %vm535_vm1, %v1672_v19  ;;  %v504_v22 = vpack.c.bf16 %v2049_v20, %v2040_v14  ;;  %v1675_v23 = vpack.c.bf16 %v2049_v20, %v2049_v20  ;;  %v476_v24 = vadd.f32 %v1600_v12, %v475_v21  ;;  %v759_v14 = vadd.f32 %v1631_v57, %v758_v50 }
  0xe2   : > { %v1726_v25 = vpop.f32.mrf.mxu0  ;;  %v761_v52 = vpop.f32.mrf.mxu1 }
  0xe3   : > { %539 = vst.msk [vmem:[#allocation3 + $0xc] sm:$0xf] %vm535_vm1, %v1675_v23  ;;  %v503_v26 = vpack.c.bf16 %v476_v24, %v2044_v17  ;;  %v1673_v27 = vpack.c.bf16 %v476_v24, %v476_v24  ;;  %v2058_v28 = vadd.f32 %v1726_v25, %v1600_v12  ;;  %v762_v20 = vadd.f32 %v1631_v57, %v761_v52 }
  0xe4   : > { %v488_v29 = vpop.f32.mrf.mxu0  ;;  %v1738_v53 = vpop.f32.mrf.mxu1 }
  0xe5   : > { %537 = vst.msk [vmem:[#allocation3 + $0x4] sm:$0xf] %vm535_vm1, %v1673_v27  ;;  %v1678_v30 = vpack.c.bf16 %v2058_v28, %v2058_v28  ;;  %v2063_v31 = vadd.f32 %v1600_v12, %v488_v29  ;;  %v783_v58 = vadd.f32 %v1738_v53, %v1631_v57 }
  0xe6   : > { %v1727_v32 = vpop.f32.mrf.mxu0  ;;  %v774_v54 = vpop.f32.mrf.mxu1 }
  0xe7   : > { %542 = vst.msk [vmem:[#allocation3 + $0x18] sm:$0xf] %vm535_vm1, %v1678_v30  ;;  %v1676_v33 = vpack.c.bf16 %v2063_v31, %v2063_v31  ;;  %v2068_v34 = vadd.f32 %v1727_v32, %v1600_v12  ;;  %v775_v1 = vadd.f32 %v1631_v57, %v774_v54  ;;  %v2127_v32 = vpack.c.bf16 %v762_v20, %v759_v14 }
  0xe8   : > { %v491_v35 = vpop.f32.mrf.mxu0  ;;  %v1739_v55 = vpop.f32.mrf.mxu1  ;;  %v1937_v54 = vmov 0  }
  0xe9   : > { %540 = vst.msk [vmem:[#allocation3 + $0x10] sm:$0xf] %vm535_vm1, %v1676_v33  ;;  %v506_v36 = vpack.c.bf16 %v2068_v34, %v2058_v28  ;;  %v1679_v37 = vpack.c.bf16 %v2068_v34, %v2068_v34  ;;  %v2075_v38 = vadd.f32 %v1600_v12, %v491_v35  ;;  %v786_v59 = vadd.f32 %v1739_v55, %v1631_v57 }
  0xea   : > { %v1835_v39 = vld [vmem:[#allocation3 + $0x8] sm:$0xff]   ;;  %v777_v60 = vpop.f32.mrf.mxu1  ;;  %v770_v12 = vadd.f32 %v1735_v51, %v1631_v57  ;;  %1821 = vset.pattern.permute.xlu1 %v1937_v54  ;;  %1822 = vset.pattern.permute.xlu0 %v1937_v54 }
  0xeb   : > { %543 = vst.msk [vmem:[#allocation3 + $0x1c] sm:$0xf] %vm535_vm1, %v1679_v37  ;;  %v505_v40 = vpack.c.bf16 %v2075_v38, %v2063_v31  ;;  %v1677_v41 = vpack.c.bf16 %v2075_v38, %v2075_v38  ;;  %825 = vrot.lane.b32.xlu1 %v1835_v39, %s1935_s29  ;;  %v2092_v2 = vpack.c.bf16 %v786_v59, %v783_v58  ;;  %v1936_v38 = vmov -inf  }
  0xec   : > { %v1838_v44 = vld [vmem:[#allocation3] sm:$0xff]   ;;  %v778_v3 = vadd.f32 %v1631_v57, %v777_v60  ;;  %v2108_v21 = vpack.c.bf16 %v770_v12, %v767_v11  ;;  %631 = vst.msk [vmem:[#allocation4] sm:$0xff] %vm630_vm5, %v1936_v38  ;;  %632 = vst.msk [vmem:[#allocation4 + $0x8] sm:$0xff] %vm630_vm5, %v1936_v38 }
  0xed   : > { %541 = vst.msk [vmem:[#allocation3 + $0x14] sm:$0xf] %vm535_vm1, %v1677_v41 }
  0xee   : > { %v2100_v8 = vpack.c.bf16 %v778_v3, %v775_v1  ;;  %633 = vst.msk [vmem:[#allocation4 + $0x10] sm:$0xff] %vm630_vm5, %v1936_v38  ;;  %634 = vst.msk [vmem:[#allocation4 + $0x18] sm:$0xff] %vm630_vm5, %v1936_v38 }
  0xef   : > { %572 = vrot.lane.b32.xlu1 %v1836_v42, %s1935_s29  ;;  %635 = vst.msk [vmem:[#allocation4 + $0x20] sm:$0xff] %vm630_vm5, %v1936_v38  ;;  %636 = vst.msk [vmem:[#allocation4 + $0x28] sm:$0xff] %vm630_vm5, %v1936_v38 }
  0xf0   : > { %637 = vst.msk [vmem:[#allocation4 + $0x30] sm:$0xff] %vm630_vm5, %v1936_v38  ;;  %638 = vst.msk [vmem:[#allocation4 + $0x38] sm:$0xff] %vm630_vm5, %v1936_v38 }
  0xf2   : > { %v1837_v43 = vld [vmem:[#allocation3 + $0x18] sm:$0xff]  }
  0xf3   : > { %829 = vrot.lane.b32.xlu0 %v1837_v43, %s1935_s29  ;;  %823 = vrot.lane.b32.xlu1 %v1838_v44, %s1935_s29  ;;  %v2193_v57 = vld [vmem:[#allocation4] sm:$0xff] }
  0xf4   : > { %v1839_v46 = vld [vmem:[#allocation3 + $0x10] sm:$0xff]  }
  0xf5   : > { %v2198_v60 = vld [vmem:[#allocation4 + $0x10] sm:$0xff] }
  0xf7   : > { %827 = vrot.lane.b32.xlu0 %v1839_v46, %s1935_s29  ;;  %578 = vrot.lane.b32.xlu1 %v1840_v45, %s1935_s29 }
  0xfb   : > { %574 = vrot.lane.b32.xlu0 %v1841_v47, %s1935_s29 }
  0xff   : > { %576 = vrot.lane.b32.xlu0 %v1842_v48, %s1935_s29 }
 0x15d   : > { %v826_v56 = vpop.permute.xlu1 %825 }
 0x15e   : > { %v837_v27 = vsel %vm580_vm2, %v2108_v21, %v826_v56  ;;  %v1938_v56 = vmov 0.0  }
 0x15f   : > { %v887_v33 = vsel %vm872_vm4, %v837_v27, 0  ;;  %640 = vst.msk [vmem:[#allocation5 + $0x8] sm:$0xff] %vm630_vm5, %v1938_v56  ;;  %639 = vst.msk [vmem:[#allocation5] sm:$0xff] %vm630_vm5, %v1938_v56 }
 0x160   : > { %641 = vst.msk [vmem:[#allocation5 + $0x10] sm:$0xff] %vm630_vm5, %v1938_v56  ;;  %642 = vst.msk [vmem:[#allocation5 + $0x18] sm:$0xff] %vm630_vm5, %v1938_v56 }
 0x161   : > { %v573_v61 = vpop.permute.xlu1 %572  ;;  %643 = vst.msk [vmem:[#allocation5 + $0x20] sm:$0xff] %vm630_vm5, %v1938_v56  ;;  %644 = vst.msk [vmem:[#allocation5 + $0x28] sm:$0xff] %vm630_vm5, %v1938_v56 }
 0x162   : > { %v583_v62 = vsel %vm580_vm2, %v503_v26, %v573_v61  ;;  %645 = vst.msk [vmem:[#allocation5 + $0x30] sm:$0xff] %vm630_vm5, %v1938_v56  ;;  %646 = vst.msk [vmem:[#allocation5 + $0x38] sm:$0xff] %vm630_vm5, %v1938_v56  ;;  %v2200_v61 = vld [vmem:[#allocation4 + $0x8] sm:$0xff] }
 0x163   : > { %v1623_v63 = vcombine.low %v583_v62, %v583_v62  ;;  %v1624_v0 = vcombine.high %v583_v62, %v583_v62  ;;  %647 = vst.msk [vmem:[#allocation6] sm:$0xff] %vm580_vm2, %v1938_v56  ;;  %648 = vst.msk [vmem:[#allocation6 + $0x8] sm:$0xff] %vm580_vm2, %v1938_v56 }
 0x164   : > { %649 = vst.msk [vmem:[#allocation6 + $0x10] sm:$0xff] %vm580_vm2, %v1938_v56  ;;  %650 = vst.msk [vmem:[#allocation6 + $0x18] sm:$0xff] %vm580_vm2, %v1938_v56 }
 0x165   : > { %622 = vst.msk [vmem:[#allocation2] sm:$0xf] %vm621_vm3, %v1623_v63  ;;  %623 = vst.msk [vmem:[#allocation2 + $0x4] sm:$0xf] %vm621_vm3, %v1624_v0  ;;  %v830_v4 = vpop.permute.xlu0 %829  ;;  %v824_v5 = vpop.permute.xlu1 %823 }
 0x166   : > { %v843_v6 = vsel %vm580_vm2, %v2092_v2, %v830_v4  ;;  %v834_v34 = vsel %vm580_vm2, %v2127_v32, %v824_v5  ;;  %651 = vst.msk [vmem:[#allocation6 + $0x20] sm:$0xff] %vm580_vm2, %v1938_v56  ;;  %652 = vst.msk [vmem:[#allocation6 + $0x28] sm:$0xff] %vm580_vm2, %v1938_v56  ;;  %v2213_v4 = vld [vmem:[#allocation4 + $0x18] sm:$0xff]  ;;  %v2215_v5 = vld [vmem:[#allocation4 + $0x20] sm:$0xff] }
 0x167   : > { %v891_v7 = vsel %vm872_vm4, %v843_v6, 0  ;;  %1772 = vmatprep.subr.msk.bf16.mxu0 %vm872_vm4, %v843_v6  ;;  %v885_v31 = vsel %vm872_vm4, %v834_v34, 0  ;;  %653 = vst.msk [vmem:[#allocation6 + $0x30] sm:$0xff] %vm580_vm2, %v1938_v56  ;;  %654 = vst.msk [vmem:[#allocation6 + $0x38] sm:$0xff] %vm580_vm2, %v1938_v56 }
 0x168   : > { %1741 = vmatpush3.bf16.xpose.msra.mxu0 %v891_v7 }
 0x169   : > { %v828_v9 = vpop.permute.xlu0 %827  ;;  %v579_v10 = vpop.permute.xlu1 %578 }
 0x16a   : > { %v840_v13 = vsel %vm580_vm2, %v2100_v8, %v828_v9  ;;  %v592_v15 = vsel %vm580_vm2, %v506_v36, %v579_v10 }
 0x16b   : > { %v1629_v16 = vcombine.low %v592_v15, %v592_v15  ;;  %v1630_v17 = vcombine.high %v592_v15, %v592_v15  ;;  %1773 = vmatprep.subr.msk.bf16.mxu0 %vm872_vm4, %v840_v13  ;;  %v889_v24 = vsel %vm872_vm4, %v840_v13, 0  ;;  %v2233_v13 = vld [vmem:[#allocation4 + $0x30] sm:$0xff]  ;;  %v2235_v15 = vld [vmem:[#allocation4 + $0x28] sm:$0xff] }
 0x16c   : > { %v1843_v18 = vld [vmem:[#allocation2] sm:$0xff]  }
 0x16d   : > { %628 = vst.msk [vmem:[#allocation2 + $0x18] sm:$0xf] %vm621_vm3, %v1629_v16  ;;  %629 = vst.msk [vmem:[#allocation2 + $0x1c] sm:$0xf] %vm621_vm3, %v1630_v17  ;;  %v575_v19 = vpop.permute.xlu0 %574  ;;  %1748 = vmatprep.mubr.msk.bf16.mxu0 %vm872_vm4, %v1843_v18 }
 0x16e   : > { %v586_v23 = vsel %vm580_vm2, %v504_v22, %v575_v19 }
 0x16f   : > { %v1625_v25 = vcombine.low %v586_v23, %v586_v23  ;;  %v1626_v26 = vcombine.high %v586_v23, %v586_v23 }
 0x170   : > { %1743 = vmatpush3.bf16.xpose.msra.mxu0 %v889_v24 }
 0x171   : > { %624 = vst.msk [vmem:[#allocation2 + $0x8] sm:$0xf] %vm621_vm3, %v1625_v25  ;;  %625 = vst.msk [vmem:[#allocation2 + $0xc] sm:$0xf] %vm621_vm3, %v1626_v26  ;;  %1774 = vmatprep.subr.msk.bf16.mxu0 %vm872_vm4, %v837_v27  ;;  %v577_v28 = vpop.permute.xlu0 %576  ;;  %v2253_v25 = vld [vmem:[#allocation4 + $0x38] sm:$0xff] }
 0x172   : > { %v589_v22 = vsel %vm580_vm2, %v505_v40, %v577_v28 }
 0x173   : > { %v1627_v29 = vcombine.low %v589_v22, %v589_v22  ;;  %v1628_v30 = vcombine.high %v589_v22, %v589_v22 }
 0x174   : > { %v1846_v37 = vld [vmem:[#allocation2 + $0x18] sm:$0xff]  }
 0x175   : > { %626 = vst.msk [vmem:[#allocation2 + $0x10] sm:$0xf] %vm621_vm3, %v1627_v29  ;;  %627 = vst.msk [vmem:[#allocation2 + $0x14] sm:$0xf] %vm621_vm3, %v1628_v30 }
 0x178   : > { %1745 = vmatpush3.bf16.xpose.msra.mxu0 %v887_v33  ;;  %v1844_v35 = vld [vmem:[#allocation2 + $0x8] sm:$0xff]  }
 0x179   : > { %1775 = vmatprep.subr.msk.bf16.mxu0 %vm872_vm4, %v834_v34 }
 0x17c   : > { %v1845_v36 = vld [vmem:[#allocation2 + $0x10] sm:$0xff]  }
 0x180   : > { %1747 = vmatpush3.bf16.xpose.msra.mxu0 %v885_v31 }
 0x187   : > { %1749 = vmatmul.mubr.msk.bf16.vlgmr.msra.gmra.mxu0 %vm872_vm4, %v1844_v35 }
 0x188   : > { %1752 = vmatprep.mubr.msk.bf16.mxu0 %vm872_vm4, %v1845_v36 }
 0x18f   : > { %1753 = vmatmul.mubr.msk.bf16.gmra.mxu0 %vm872_vm4, %v1846_v37 }
 0x247   : > { %v2145_v39 = vpop.f32.mrf.mxu0 }
 0x248   : > { %v973_v44 = vsel %vm966_vm6, %v2145_v39, -inf }
 0x249   : > { %v2147_v40 = vpop.f32.mrf.mxu0 }
 0x24a   : > { %v967_v41 = vsel %vm966_vm6, %v2147_v40, -inf }
 0x24b   : > { %968 = vmax.xlane.f32.xlu0 %v967_v41  ;;  %v2151_v42 = vpop.f32.mrf.mxu0 }
 0x24c   : > { %v976_v48 = vsel %vm966_vm6, %v2151_v42, -inf }
 0x24d   : > { %v2153_v43 = vpop.f32.mrf.mxu0 }
 0x24e   : > { %v970_v45 = vsel %vm966_vm6, %v2153_v43, -inf }
 0x24f   : > { %974 = vmax.xlane.f32.xlu0 %v973_v44  ;;  %971 = vmax.xlane.f32.xlu1 %v970_v45  ;;  %v2159_v46 = vpop.f32.mrf.mxu0 }
 0x250   : > { %v985_v52 = vsel %vm966_vm6, %v2159_v46, -inf }
 0x251   : > { %v2161_v47 = vpop.f32.mrf.mxu0 }
 0x252   : > { %v979_v49 = vsel %vm966_vm6, %v2161_v47, -inf }
 0x253   : > { %977 = vmax.xlane.f32.xlu0 %v976_v48  ;;  %980 = vmax.xlane.f32.xlu1 %v979_v49  ;;  %v2167_v50 = vpop.f32.mrf.mxu0 }
 0x254   : > { %v988_v55 = vsel %vm966_vm6, %v2167_v50, -inf }
 0x255   : > { %v2169_v51 = vpop.f32.mrf.mxu0 }
 0x256   : > { %v982_v53 = vsel %vm966_vm6, %v2169_v51, -inf }
 0x257   : > { %986 = vmax.xlane.f32.xlu1 %v985_v52  ;;  %983 = vmax.xlane.f32.xlu0 %v982_v53 }
 0x25b   : > { %989 = vmax.xlane.f32.xlu0 %v988_v55 }
 0x2d4   : > { %v969_v58 = vpop.xlane.xlu0 %968 }
 0x2d5   : > { %v2196_v59 = vmax.f32 %v2193_v57, %v969_v58 }
 0x2d7   : > { %v999_v62 = vsub.f32 %v2193_v57, %v2196_v59  ;;  %1313 = vst.msk [vmem:[#allocation4] sm:$0xff] %vm630_vm5, %v2196_v59  ;;  %1025 = vperm.xlu1 %1821, %v2196_v59  }
 0x2d8   : > { %v975_v63 = vpop.xlane.xlu0 %974  ;;  %v972_v0 = vpop.xlane.xlu1 %971 }
 0x2d9   : > { %v2208_v1 = vmax.f32 %v2198_v60, %v975_v63  ;;  %v2211_v3 = vmax.f32 %v2200_v61, %v972_v0 }
 0x2db   : > { %v1001_v6 = vsub.f32 %v2198_v60, %v2208_v1  ;;  %1315 = vst.msk [vmem:[#allocation4 + $0x10] sm:$0xff] %vm630_vm5, %v2208_v1  ;;  %v1000_v7 = vsub.f32 %v2200_v61, %v2211_v3  ;;  %1314 = vst.msk [vmem:[#allocation4 + $0x8] sm:$0xff] %vm630_vm5, %v2211_v3  ;;  %1035 = vperm.xlu1 %1821, %v2208_v1   ;;  %1030 = vperm.xlu0 %1822, %v2211_v3  }
 0x2dc   : > { %v978_v9 = vpop.xlane.xlu0 %977  ;;  %v981_v10 = vpop.xlane.xlu1 %980 }
 0x2dd   : > { %v2228_v11 = vmax.f32 %v2213_v4, %v978_v9  ;;  %v2231_v12 = vmax.f32 %v2215_v5, %v981_v10  ;;  %v1009_v1 = vmul.f32 1.442695, %v1000_v7 }
 0x2df   : > { %v1002_v16 = vsub.f32 %v2213_v4, %v2228_v11  ;;  %1316 = vst.msk [vmem:[#allocation4 + $0x18] sm:$0xff] %vm630_vm5, %v2228_v11  ;;  %v1003_v17 = vsub.f32 %v2215_v5, %v2231_v12  ;;  %1317 = vst.msk [vmem:[#allocation4 + $0x20] sm:$0xff] %vm630_vm5, %v2231_v12  ;;  %1040 = vperm.xlu1 %1821, %v2228_v11   ;;  %1210 = vrot.lane.b32.xlu0 %v2108_v21, %s1939_s10 }
 0x2e0   : > { %v987_v18 = vpop.xlane.xlu1 %986  ;;  %v984_v19 = vpop.xlane.xlu0 %983 }
 0x2e1   : > { %v2248_v23 = vmax.f32 %v2233_v13, %v987_v18  ;;  %v2251_v24 = vmax.f32 %v2235_v15, %v984_v19  ;;  %v1013_v57 = vmul.f32 1.442695, %v1002_v16  ;;  %v1015_v11 = vmul.f32 1.442695, %v1003_v17  ;;  %v1088_v17 = vld [vmem:[#allocation5 + $0x8] sm:$0xff] }
 0x2e3   : > { %v1005_v26 = vsub.f32 %v2233_v13, %v2248_v23  ;;  %1319 = vst.msk [vmem:[#allocation4 + $0x30] sm:$0xff] %vm630_vm5, %v2248_v23  ;;  %v1004_v27 = vsub.f32 %v2235_v15, %v2251_v24  ;;  %1318 = vst.msk [vmem:[#allocation4 + $0x28] sm:$0xff] %vm630_vm5, %v2251_v24  ;;  %1055 = vperm.xlu1 %1821, %v2248_v23   ;;  %v1087_v23 = vld [vmem:[#allocation5] sm:$0xff] }
 0x2e4   : > { %v990_v21 = vpop.xlane.xlu0 %989 }
 0x2e5   : > { %v2265_v28 = vmax.f32 %v2253_v25, %v990_v21  ;;  %v1007_v21 = vmul.f32 1.442695, %v999_v62  ;;  %v1017_v60 = vmul.f32 1.442695, %v1004_v27  ;;  %v1019_v61 = vmul.f32 1.442695, %v1005_v26 }
 0x2e7   : > { %v1006_v14 = vsub.f32 %v2253_v25, %v2265_v28  ;;  %1320 = vst.msk [vmem:[#allocation4 + $0x38] sm:$0xff] %vm630_vm5, %v2265_v28  ;;  %1045 = vperm.xlu1 %1821, %v2231_v12   ;;  %v1089_v12 = vld [vmem:[#allocation5 + $0x10] sm:$0xff] }
 0x2e9   : > { %v1021_v4 = vmul.f32 1.442695, %v1006_v14 }
 0x2eb   : > { %1060 = vperm.xlu1 %1821, %v2265_v28  }
 0x2ef   : > { %1050 = vperm.xlu1 %1821, %v2251_v24  }
 0x2f3   : > { %1214 = vrot.lane.b32.xlu1 %v2092_v2, %s1939_s10 }
 0x2f7   : > { %1212 = vrot.lane.b32.xlu1 %v2100_v8, %s1939_s10 }
 0x2fb   : > { %1208 = vrot.lane.b32.xlu1 %v2127_v32, %s1939_s10 }
 0x352   : > { %v1026_v20 = vpop.permute.xlu1 %1025 }
 0x353   : > { %v1063_v22 = vsub.f32 %v2147_v40, %v1026_v20 }
 0x355   : > { %v1071_v29 = vmul.f32 1.442695, %v1063_v22 }
 0x356   : > { %v1036_v30 = vpop.permute.xlu1 %1035  ;;  %v1031_v33 = vpop.permute.xlu0 %1030 }
 0x357   : > { %v1065_v34 = vsub.f32 %v2145_v39, %v1036_v30  ;;  %v1064_v31 = vsub.f32 %v2153_v43, %v1031_v33  ;;  %1847 = vpow2.f32 %v1071_v29  ;;  %v1011_v30 = vmul.f32 1.442695, %v1001_v6 }
 0x359   : > { %v1075_v35 = vmul.f32 1.442695, %v1065_v34  ;;  %v1073_v36 = vmul.f32 1.442695, %v1064_v31 }
 0x35a   : > { %v1041_v37 = vpop.permute.xlu1 %1040  ;;  %v1211_v10 = vpop.permute.xlu0 %1210 }
 0x35b   : > { %1849 = vpow2.f32 %v1075_v35  ;;  %v1066_v2 = vsub.f32 %v2151_v42, %v1041_v37 }
 0x35c   : > { %1851 = vpow2.f32 %v1073_v36 }
 0x35d   : > { %v1077_v8 = vmul.f32 1.442695, %v1066_v2 }
 0x35e   : > { %v1056_v32 = vpop.permute.xlu1 %1055 }
 0x35f   : > { %1853 = vpow2.f32 %v1077_v8  ;;  %v1069_v38 = vsub.f32 %v2159_v46, %v1056_v32  ;;  %v1090_v8 = vld [vmem:[#allocation5 + $0x18] sm:$0xff] }
 0x361   : > { %v1083_v44 = vmul.f32 1.442695, %v1069_v38 }
 0x362   : > { %v1046_v40 = vpop.permute.xlu1 %1045 }
 0x363   : > { %v1067_v41 = vsub.f32 %v2161_v47, %v1046_v40 }
 0x364   : > { %v1848_v43 = vpop.eup %1847 }
 0x365   : > { %v1079_v39 = vmul.f32 1.442695, %v1067_v41  ;;  %v1103_v58 = vsel %vm966_vm6, %v1848_v43, 0.0  ;;  %v1091_v41 = vld [vmem:[#allocation5 + $0x20] sm:$0xff] }
 0x366   : > { %v1061_v45 = vpop.permute.xlu1 %1060 }
 0x367   : > { %1855 = vpow2.f32 %v1079_v39  ;;  %v1070_v52 = vsub.f32 %v2167_v50, %v1061_v45 }
 0x368   : > { %v1850_v48 = vpop.eup %1849  ;;  %1857 = vpow2.f32 %v1083_v44 }
 0x369   : > { %v1852_v49 = vpop.eup %1851  ;;  %v1109_v42 = vsel %vm966_vm6, %v1850_v48, 0.0  ;;  %v1085_v47 = vmul.f32 1.442695, %v1070_v52 }
 0x36a   : > { %1110 = vadd.xlane.f32.xlu0 %v1109_v42  ;;  %v1051_v53 = vpop.permute.xlu1 %1050  ;;  %v1106_v54 = vsel %vm966_vm6, %v1852_v49, 0.0  ;;  %v1200_v46 = vpack.c.bf16 %v1852_v49, %v1848_v43 }
 0x36b   : > { %v1068_v55 = vsub.f32 %v2169_v51, %v1051_v53  ;;  %1107 = vadd.xlane.f32.xlu1 %v1106_v54  ;;  %v1092_v54 = vld [vmem:[#allocation5 + $0x28] sm:$0xff] }
 0x36c   : > { %1764 = vmatprep.mubr.msk.bf16.mxu1 %vm966_vm6, %v1200_v46  ;;  %v1854_v63 = vpop.eup %1853 }
 0x36d   : > { %v1081_v56 = vmul.f32 1.442695, %v1068_v55  ;;  %v1112_v50 = vsel %vm966_vm6, %v1854_v63, 0.0  ;;  %v1201_v33 = vpack.c.bf16 %v1854_v63, %v1850_v48  ;;  %v1093_v48 = vld [vmem:[#allocation5 + $0x30] sm:$0xff]  ;;  %v1094_v63 = vld [vmem:[#allocation5 + $0x38] sm:$0xff] }
 0x36e   : > { %1104 = vadd.xlane.f32.xlu0 %v1103_v58  ;;  %v1215_v0 = vpop.permute.xlu1 %1214 }
 0x36f   : > { %1859 = vpow2.f32 %v1081_v56  ;;  %1756 = vmatprep.subr.bf16.mxu1 %v1215_v0 }
 0x370   : > { %1757 = vmatpush3.bf16.msra.mxu1 %v1215_v0  ;;  %1861 = vpow2.f32 %v1085_v47 }
 0x371   : > { %1863 = vpow2.f32 %v1007_v21 }
 0x372   : > { %1113 = vadd.xlane.f32.xlu0 %v1112_v50  ;;  %v1213_v9 = vpop.permute.xlu1 %1212  ;;  %1865 = vpow2.f32 %v1011_v30 }
 0x373   : > { %1758 = vmatprep.subr.bf16.mxu1 %v1213_v9  ;;  %1867 = vpow2.f32 %v1013_v57 }
 0x374   : > { %v1856_v51 = vpop.eup %1855  ;;  %1759 = vmatpush3.bf16.msra.mxu1 %v1213_v9  ;;  %1869 = vpow2.f32 %v1017_v60 }
 0x375   : > { %1760 = vmatprep.subr.bf16.mxu1 %v1211_v10  ;;  %v1115_v18 = vsel %vm966_vm6, %v1856_v51, 0.0  ;;  %v1858_v19 = vpop.eup %1857  ;;  %1871 = vpow2.f32 %v1009_v1 }
 0x376   : > { %1116 = vadd.xlane.f32.xlu1 %v1115_v18  ;;  %v1209_v20 = vpop.permute.xlu1 %1208  ;;  %v1121_v22 = vsel %vm966_vm6, %v1858_v19, 0.0  ;;  %1873 = vpow2.f32 %v1021_v4 }
 0x377   : > { %1875 = vpow2.f32 %v1015_v11 }
 0x378   : > { %1761 = vmatpush3.bf16.msra.mxu1 %v1211_v10  ;;  %1877 = vpow2.f32 %v1019_v61 }
 0x379   : > { %1762 = vmatprep.subr.bf16.mxu1 %v1209_v20 }
 0x37a   : > { %1122 = vadd.xlane.f32.xlu1 %v1121_v22 }
 0x37c   : > { %v1860_v29 = vpop.eup %1859  ;;  %1763 = vmatpush3.bf16.msra.mxu1 %v1209_v20 }
 0x37d   : > { %v1118_v34 = vsel %vm966_vm6, %v1860_v29, 0.0  ;;  %v1202_v31 = vpack.c.bf16 %v1860_v29, %v1856_v51  ;;  %v1862_v35 = vpop.eup %1861 }
 0x37e   : > { %1119 = vadd.xlane.f32.xlu0 %v1118_v34  ;;  %v1124_v59 = vsel %vm966_vm6, %v1862_v35, 0.0  ;;  %v1203_v62 = vpack.c.bf16 %v1862_v35, %v1858_v19  ;;  %v1864_v6 = vpop.eup %1863 }
 0x37f   : > { %1765 = vmatmul.mubr.msk.bf16.vlgmr.msra.gmra.mxu1 %vm966_vm6, %v1201_v33  ;;  %v1866_v15 = vpop.eup %1865  ;;  %v1095_v37 = vmul.f32 %v1864_v6, %v1087_v23 }
 0x380   : > { %1768 = vmatprep.mubr.msk.bf16.mxu1 %vm966_vm6, %v1202_v31  ;;  %v1868_v3 = vpop.eup %1867  ;;  %v1097_v27 = vmul.f32 %v1866_v15, %v1089_v12 }
 0x381   : > { %v1870_v7 = vpop.eup %1869  ;;  %v1098_v38 = vmul.f32 %v1868_v3, %v1090_v8 }
 0x382   : > { %1125 = vadd.xlane.f32.xlu0 %v1124_v59  ;;  %v1872_v16 = vpop.eup %1871  ;;  %v1100_v47 = vmul.f32 %v1870_v7, %v1092_v54 }
 0x383   : > { %v1874_v24 = vpop.eup %1873  ;;  %v1096_v28 = vmul.f32 %v1872_v16, %v1088_v17  ;;  %v1150_v17 = vld [vmem:[#allocation6 + $0x30] sm:$0xff] }
 0x384   : > { %v1876_v25 = vpop.eup %1875  ;;  %v1102_v9 = vmul.f32 %v1874_v24, %v1094_v63 }
 0x385   : > { %v1878_v5 = vpop.eup %1877  ;;  %v1099_v45 = vmul.f32 %v1876_v25, %v1091_v41  ;;  %v1149_v41 = vld [vmem:[#allocation6 + $0x28] sm:$0xff] }
 0x386   : > { %v1101_v42 = vmul.f32 %v1878_v5, %v1093_v48 }
 0x387   : > { %1769 = vmatmul.mubr.msk.bf16.gmra.mxu1 %vm966_vm6, %v1203_v62  ;;  %v1146_v62 = vld [vmem:[#allocation6 + $0x10] sm:$0xff] }
 0x38b   : > { %1154 = vperm.xlu1 %1821, %v1864_v6   ;;  %v1144_v6 = vld [vmem:[#allocation6] sm:$0xff] }
 0x38f   : > { %1164 = vperm.xlu1 %1821, %v1866_v15   ;;  %v1147_v15 = vld [vmem:[#allocation6 + $0x18] sm:$0xff] }
 0x393   : > { %1169 = vperm.xlu1 %1821, %v1868_v3  }
 0x397   : > { %1179 = vperm.xlu1 %1821, %v1870_v7  }
 0x398   : > { %1159 = vperm.xlu0 %1822, %v1872_v16  }
 0x39b   : > { %1189 = vperm.xlu1 %1821, %v1874_v24   ;;  %v1145_v24 = vld [vmem:[#allocation6 + $0x8] sm:$0xff] }
 0x39c   : > { %1174 = vperm.xlu0 %1822, %v1876_v25  }
 0x3a0   : > { %1184 = vperm.xlu0 %1822, %v1878_v5  }
 0x3f3   : > { %v1111_v13 = vpop.xlane.xlu0 %1110 }
 0x3f4   : > { %v1108_v26 = vpop.xlane.xlu1 %1107  ;;  %v1129_v14 = vadd.f32 %v1111_v13, %v1097_v27 }
 0x3f5   : > { %v1128_v36 = vadd.f32 %v1108_v26, %v1096_v28  ;;  %v1148_v26 = vld [vmem:[#allocation6 + $0x20] sm:$0xff] }
 0x3f6   : > { %1138 = vst.msk [vmem:[#allocation5 + $0x10] sm:$0xff] %vm630_vm5, %v1129_v14 }
 0x3f7   : > { %1137 = vst.msk [vmem:[#allocation5 + $0x8] sm:$0xff] %vm630_vm5, %v1128_v36  ;;  %v1105_v2 = vpop.xlane.xlu0 %1104 }
 0x3f8   : > { %v1127_v32 = vadd.f32 %v1105_v2, %v1095_v37  ;;  %v1151_v2 = vld [vmem:[#allocation6 + $0x38] sm:$0xff] }
 0x3fa   : > { %1136 = vst.msk [vmem:[#allocation5] sm:$0xff] %vm630_vm5, %v1127_v32 }
 0x3fb   : > { %v1114_v40 = vpop.xlane.xlu0 %1113 }
 0x3fc   : > { %v1130_v44 = vadd.f32 %v1114_v40, %v1098_v38 }
 0x3fd   : > { %v1334_v39 = vld [vmem:[#allocation5 + $0x10] sm:$0xff] }
 0x3fe   : > { %1139 = vst.msk [vmem:[#allocation5 + $0x18] sm:$0xff] %vm630_vm5, %v1130_v44  ;;  %1879 = vrcp.f32 %v1334_v39  ;;  %v1333_v56 = vld [vmem:[#allocation5 + $0x8] sm:$0xff] }
 0x3ff   : > { %v1117_v43 = vpop.xlane.xlu1 %1116 }
 0x400   : > { %v1131_v49 = vadd.f32 %v1117_v43, %v1099_v45 }
 0x401   : > { %v1332_v52 = vld [vmem:[#allocation5] sm:$0xff] }
 0x402   : > { %1140 = vst.msk [vmem:[#allocation5 + $0x20] sm:$0xff] %vm630_vm5, %v1131_v49  ;;  %1881 = vrcp.f32 %v1332_v52 }
 0x403   : > { %v1123_v53 = vpop.xlane.xlu1 %1122 }
 0x404   : > { %v1133_v46 = vadd.f32 %v1123_v53, %v1101_v42 }
 0x405   : > { %v1335_v55 = vld [vmem:[#allocation5 + $0x18] sm:$0xff] }
 0x406   : > { %1142 = vst.msk [vmem:[#allocation5 + $0x30] sm:$0xff] %vm630_vm5, %v1133_v46  ;;  %1883 = vrcp.f32 %v1335_v55 }
 0x407   : > { %v1120_v58 = vpop.xlane.xlu0 %1119  ;;  %1885 = vrcp.f32 %v1333_v56  ;;  %v1155_v57 = vpop.permute.xlu1 %1154 }
 0x408   : > { %v1132_v0 = vadd.f32 %v1120_v58, %v1100_v47  ;;  %v1192_v3 = vmul.f32 %v1155_v57, %v1144_v6 }
 0x409   : > { %v1336_v50 = vld [vmem:[#allocation5 + $0x20] sm:$0xff] }
 0x40a   : > { %1141 = vst.msk [vmem:[#allocation5 + $0x28] sm:$0xff] %vm630_vm5, %v1132_v0  ;;  %1887 = vrcp.f32 %v1336_v50 }
 0x40b   : > { %v1880_v51 = vpop.eup %1879  ;;  %v1126_v10 = vpop.xlane.xlu0 %1125 }
 0x40c   : > { %v1134_v18 = vadd.f32 %v1126_v10, %v1102_v9  ;;  %1360 = vperm.xlu0 %1822, %v1880_v51   ;;  %v1165_v59 = vpop.permute.xlu1 %1164 }
 0x40d   : > { %v1338_v19 = vld [vmem:[#allocation5 + $0x30] sm:$0xff]  ;;  %v1194_v11 = vmul.f32 %v1165_v59, %v1146_v62 }
 0x40e   : > { %1143 = vst.msk [vmem:[#allocation5 + $0x38] sm:$0xff] %vm630_vm5, %v1134_v18  ;;  %1889 = vrcp.f32 %v1338_v19 }
 0x40f   : > { %v1882_v21 = vpop.eup %1881 }
 0x410   : > { %1350 = vperm.xlu0 %1822, %v1882_v21   ;;  %v1170_v1 = vpop.permute.xlu1 %1169 }
 0x411   : > { %v1337_v20 = vld [vmem:[#allocation5 + $0x28] sm:$0xff]  ;;  %v1195_v5 = vmul.f32 %v1170_v1, %v1147_v15 }
 0x412   : > { %1891 = vrcp.f32 %v1337_v20 }
 0x413   : > { %v1884_v22 = vpop.eup %1883  ;;  %v1160_v60 = vpop.permute.xlu0 %1159 }
 0x414   : > { %1365 = vperm.xlu1 %1821, %v1884_v22   ;;  %v1886_v30 = vpop.eup %1885  ;;  %v1180_v16 = vpop.permute.xlu1 %1179  ;;  %v1193_v13 = vmul.f32 %v1160_v60, %v1145_v24 }
 0x415   : > { %v1339_v29 = vld [vmem:[#allocation5 + $0x38] sm:$0xff]  ;;  %v1197_v48 = vmul.f32 %v1180_v16, %v1149_v41 }
 0x416   : > { %1893 = vrcp.f32 %v1339_v29 }
 0x417   : > { %v1888_v33 = vpop.eup %1887  ;;  %v1175_v4 = vpop.permute.xlu0 %1174 }
 0x418   : > { %1370 = vperm.xlu0 %1822, %v1888_v33   ;;  %1355 = vperm.xlu1 %1821, %v1886_v30   ;;  %v1190_v8 = vpop.permute.xlu1 %1189  ;;  %v1196_v38 = vmul.f32 %v1175_v4, %v1148_v26 }
 0x419   : > { %v1199_v39 = vmul.f32 %v1190_v8, %v1151_v2 }
 0x41b   : > { %v1890_v34 = vpop.eup %1889  ;;  %v1185_v27 = vpop.permute.xlu0 %1184 }
 0x41c   : > { %1380 = vperm.xlu0 %1822, %v1890_v34   ;;  %v1198_v36 = vmul.f32 %v1185_v27, %v1150_v17 }
 0x41f   : > { %v1892_v31 = vpop.eup %1891 }
 0x420   : > { %1375 = vperm.xlu1 %1821, %v1892_v31  }
 0x423   : > { %v1894_v35 = vpop.eup %1893 }
 0x424   : > { %1385 = vperm.xlu1 %1821, %v1894_v35  }
 0x43f   : > { %v1766_v61 = vpop.f32.mrf.mxu1 }
 0x440   : > { %v1299_v7 = vadd.f32 %v1766_v61, %v1194_v11 }
 0x441   : > { %v1266_v25 = vpop.f32.mrf.mxu1 }
 0x442   : > { %1307 = vst.msk [vmem:[#allocation6 + $0x10] sm:$0xff] %vm580_vm2, %v1299_v7  ;;  %v1297_v12 = vadd.f32 %v1266_v25, %v1192_v3 }
 0x443   : > { %v1767_v28 = vpop.f32.mrf.mxu1 }
 0x444   : > { %1305 = vst.msk [vmem:[#allocation6] sm:$0xff] %vm580_vm2, %v1297_v12  ;;  %v1300_v23 = vadd.f32 %v1767_v28, %v1195_v5 }
 0x445   : > { %v1269_v14 = vpop.f32.mrf.mxu1 }
 0x446   : > { %1308 = vst.msk [vmem:[#allocation6 + $0x18] sm:$0xff] %vm580_vm2, %v1300_v23  ;;  %v1298_v37 = vadd.f32 %v1269_v14, %v1193_v13 }
 0x447   : > { %v1770_v32 = vpop.f32.mrf.mxu1 }
 0x448   : > { %1306 = vst.msk [vmem:[#allocation6 + $0x8] sm:$0xff] %vm580_vm2, %v1298_v37  ;;  %v1303_v40 = vadd.f32 %v1770_v32, %v1198_v36 }
 0x449   : > { %v1282_v44 = vpop.f32.mrf.mxu1  ;;  %v1326_v53 = vld [vmem:[#allocation6 + $0x10] sm:$0xff] }
 0x44a   : > { %1311 = vst.msk [vmem:[#allocation6 + $0x30] sm:$0xff] %vm580_vm2, %v1303_v40  ;;  %v1301_v45 = vadd.f32 %v1282_v44, %v1196_v38 }
 0x44b   : > { %v1771_v43 = vpop.f32.mrf.mxu1  ;;  %v1324_v47 = vld [vmem:[#allocation6] sm:$0xff] }
 0x44c   : > { %1309 = vst.msk [vmem:[#allocation6 + $0x20] sm:$0xff] %vm580_vm2, %v1301_v45  ;;  %v1304_v49 = vadd.f32 %v1771_v43, %v1199_v39 }
 0x44d   : > { %v1285_v52 = vpop.f32.mrf.mxu1  ;;  %v1327_v0 = vld [vmem:[#allocation6 + $0x18] sm:$0xff] }
 0x44e   : > { %1312 = vst.msk [vmem:[#allocation6 + $0x38] sm:$0xff] %vm580_vm2, %v1304_v49  ;;  %v1302_v42 = vadd.f32 %v1285_v52, %v1197_v48 }
 0x44f   : > { %v1325_v18 = vld [vmem:[#allocation6 + $0x8] sm:$0xff] }
 0x450   : > { %1310 = vst.msk [vmem:[#allocation6 + $0x28] sm:$0xff] %vm580_vm2, %v1302_v42 }
 0x451   : > { %v1330_v33 = vld [vmem:[#allocation6 + $0x30] sm:$0xff] }
 0x453   : > { %v1328_v19 = vld [vmem:[#allocation6 + $0x20] sm:$0xff] }
 0x455   : > { %v1331_v1 = vld [vmem:[#allocation6 + $0x38] sm:$0xff] }
 0x457   : > { %v1329_v57 = vld [vmem:[#allocation6 + $0x28] sm:$0xff] }
 0x487   : > { %v1361_v54 = vpop.permute.xlu0 %1360 }
 0x488   : > { %v1390_v46 = vmul.f32 %v1361_v54, %v1326_v53 }
 0x48a   : > { %v1682_v55 = vpack.c.bf16 %v1390_v46, %v1390_v46 }
 0x48b   : > { %v1351_v56 = vpop.permute.xlu0 %1350 }
 0x48c   : > { %1431 = vst.msk [vmem:[%s2343_s16 + $0x8] sm:$0xf] %vm535_vm1, %v1682_v55  ;;  %v1388_v58 = vmul.f32 %v1351_v56, %v1324_v47 }
 0x48e   : > { %v1680_v63 = vpack.c.bf16 %v1388_v58, %v1388_v58 }
 0x48f   : > { %v1366_v50 = vpop.permute.xlu1 %1365 }
 0x490   : > { %1429 = vst.msk [vmem:[%s2343_s16] sm:$0xf] %vm535_vm1, %v1680_v63  ;;  %v1391_v9 = vmul.f32 %v1366_v50, %v1327_v0 }
 0x492   : > { %v1683_v51 = vpack.c.bf16 %v1391_v9, %v1391_v9 }
 0x493   : > { %v1356_v10 = vpop.permute.xlu1 %1355  ;;  %v1371_v21 = vpop.permute.xlu0 %1370 }
 0x494   : > { %1432 = vst.msk [vmem:[%s2343_s16 + $0xc] sm:$0xf] %vm535_vm1, %v1683_v51  ;;  %v1389_v20 = vmul.f32 %v1356_v10, %v1325_v18  ;;  %v1392_v22 = vmul.f32 %v1371_v21, %v1328_v19 }
 0x496   : > { %v1681_v29 = vpack.c.bf16 %v1389_v20, %v1389_v20  ;;  %v1684_v30 = vpack.c.bf16 %v1392_v22, %v1392_v22 }
 0x497   : > { %v1381_v34 = vpop.permute.xlu0 %1380 }
 0x498   : > { %1430 = vst.msk [vmem:[%s2343_s16 + $0x4] sm:$0xf] %vm535_vm1, %v1681_v29  ;;  %1433 = vst.msk [vmem:[%s2343_s16 + $0x10] sm:$0xf] %vm535_vm1, %v1684_v30  ;;  %v1394_v31 = vmul.f32 %v1381_v34, %v1330_v33 }
 0x49a   : > { %v1686_v35 = vpack.c.bf16 %v1394_v31, %v1394_v31 }
 0x49b   : > { %v1376_v59 = vpop.permute.xlu1 %1375 }
 0x49c   : > { %1435 = vst.msk [vmem:[%s2343_s16 + $0x18] sm:$0xf] %vm535_vm1, %v1686_v35  ;;  %v1393_v60 = vmul.f32 %v1376_v59, %v1329_v57 }
 0x49e   : > { %v1685_v62 = vpack.c.bf16 %v1393_v60, %v1393_v60 }
 0x49f   : > { %v1386_v6 = vpop.permute.xlu1 %1385 }
 0x4a0   : > { %1434 = vst.msk [vmem:[%s2343_s16 + $0x14] sm:$0xf] %vm535_vm1, %v1685_v62  ;;  %v1395_v4 = vmul.f32 %v1386_v6, %v1331_v1 }
 0x4a2   : > { %v1687_v11 = vpack.c.bf16 %v1395_v4, %v1395_v4 }
 0x4a4   : > { %1436 = vst.msk [vmem:[%s2343_s16 + $0x1c] sm:$0xf] %vm535_vm1, %v1687_v11 }
 0x4a5 PF: > { %s16_s25 = sadd.s32 1, %s1933_s25   ;;  %s2383_s21 = smov %s1925_s23 }
 0x4a6   : > { %p13_p7 = scmp.ge.s32.totalorder %s16_s25, 10   ;;  %s2384_s22 = smov %s1929_s24 }
 0x4a7   : > { %s2385_s23 = smov %s2388_s26  ;;  %s2386_s24 = smov %s2392_s27 }
 0x4a8   :  { %15 = sbr.rel (!%p13_p7) target bundleno = 3 (0x3), region = 99 }

</bundles_post_ra>
